<compile_context>
chip_gen: v5e
topology: v5e:2x2
jax: 0.10.0
libtpu: 0.0.40
codegen_flags: <defaults>
</compile_context>

<pallas_src>
import jax
import jax.numpy as jnp
from jax.experimental import pallas as pl
from jax.experimental.pallas import tpu as pltpu

_EPS = 1e-12  # torch.nn.functional.normalize default eps


def _round_up(v, m):
    return (v + m - 1) // m * m


def _largest_tile(total, cap):
    """Largest multiple of 128 <= cap that evenly divides `total`
    (total must itself be a multiple of 128)."""
    t = max(128, min(cap, total))
    t -= t % 128
    while total % t:
        t -= 128
    return t


def _pad_feature_dim(D, tk_max):
    """(padded feature dim, contraction tile) such that tk_e divides D_p."""
    d128 = _round_up(D, 128)
    if d128 <= tk_max:
        return d128, d128          # single K step (typical: feature_dim <= 2048)
    return _round_up(D, 1024), 1024


def _l2_normalize_rows(v):
    v32 = v.astype(jnp.float32)
    inv = jax.lax.rsqrt(
        jnp.maximum(jnp.sum(v32 * v32, axis=1, keepdims=True), _EPS * _EPS))
    return v32 * inv


def prepare_weight(weight, *, tk_max=2048, operand_dtype=jnp.bfloat16):
    """One-time conversion of the (static) class-center parameter.

    Returns a (C_p, D_p) row-normalized, lane/tile-aligned operand that the
    caller should cache and reuse across forward calls.
    """
    C, D = weight.shape
    C_p = _round_up(C, 128)
    D_p, _ = _pad_feature_dim(D, tk_max)
    w_n = _l2_normalize_rows(weight).astype(operand_dtype)
    if (C_p, D_p) != (C, D):       # skip the pad copy when already aligned
        w_n = jnp.pad(w_n, ((0, C_p - C), (0, D_p - D)))
    return w_n


def _fg_kernel(x_ref, w_ref, o_ref):
    # x_ref: (tm, tk) operand dtype   w_ref: (tn, tk) operand dtype
    # o_ref: (tm, tn) f32 — block index is k-invariant, so it doubles as the
    # accumulator (no VMEM scratch).
    k = pl.program_id(2)
    prod = jax.lax.dot_general(
        x_ref[...], w_ref[...],
        dimension_numbers=(((1,), (1,)), ((), ())),   # contract feature dims
        preferred_element_type=jnp.float32,
    )

    @pl.when(k == 0)
    def _():
        o_ref[...] = prod

    @pl.when(k != 0)
    def _():
        o_ref[...] += prod


def fg_classifier_forward(x, w_prepared, num_classes, *,
                          tm=512, tn=512, tk_max=2048,
                          operand_dtype=jnp.bfloat16):
    """Cosine logits x_norm @ w_norm.T using the cached operand from
    prepare_weight() (same tk_max / operand_dtype must be used for both)."""
    B, D = x.shape
    C_p, D_p = w_prepared.shape
    C = num_classes
    assert C <= C_p and C_p % 128 == 0

    # x prep: fold 1/||x|| into the rows, cast, pad feature (and maybe batch) dim.
    x_n = _l2_normalize_rows(x).astype(operand_dtype)
    if B <= tm:
        # Whole batch in one tile: M dim stays unpadded (full-dim block), weight
        # is streamed from HBM exactly once, no post-kernel row slice.
        B_p, tm_e = B, B
        if D_p != D:
            x_n = jnp.pad(x_n, ((0, 0), (0, D_p - D)))
    else:
        tm_e = tm
        B_p = _round_up(B, tm_e)
        if (B_p, D_p) != (B, D):
            x_n = jnp.pad(x_n, ((0, B_p - B), (0, D_p - D)))

    # Tile sizes / grid.
    tk_e = D_p if D_p <= tk_max else 1024
    assert D_p % tk_e == 0
    grid_i = B_p // tm_e
    tn_e = _largest_tile(C_p, tn)
    if grid_i == 1 and C_p // tn_e < 2 and C_p > 128:
        # v7x megacore: keep >= 2 "parallel" grid points so both TCs get work.
        tn_e = _largest_tile(C_p, C_p // 2)
    grid = (grid_i, C_p // tn_e, D_p // tk_e)

    op_bytes = jnp.dtype(operand_dtype).itemsize
    cost = pl.CostEstimate(
        flops=2 * B_p * C_p * D_p,
        transcendentals=0,
        bytes_accessed=grid[1] * B_p * D_p * op_bytes    # x re-streamed per class tile
        + grid[0] * C_p * D_p * op_bytes                  # w re-streamed per batch tile
        + B_p * C_p * 4,
    )

    vmem_need = 2 * (tm_e * tk_e * op_bytes               # double-buffered x tile
                     + tn_e * tk_e * op_bytes             # double-buffered w tile
                     + tm_e * tn_e * 4)                   # double-buffered out tile
    vmem_limit = min(max(vmem_need + (8 << 20), 32 << 20), 48 << 20)

    out_p = pl.pallas_call(
        _fg_kernel,
        out_shape=jax.ShapeDtypeStruct((B_p, C_p), jnp.float32),
        grid_spec=pltpu.PrefetchScalarGridSpec(
            num_scalar_prefetch=0,
            grid=grid,
            in_specs=[
                pl.BlockSpec((tm_e, tk_e), lambda i, j, k: (i, k)),  # x tile
                pl.BlockSpec((tn_e, tk_e), lambda i, j, k: (j, k)),  # w tile
            ],
            out_specs=pl.BlockSpec((tm_e, tn_e), lambda i, j, k: (i, j)),
        ),
        compiler_params=pltpu.CompilerParams(
            dimension_semantics=("parallel", "parallel", "arbitrary"),
            vmem_limit_bytes=vmem_limit,
        ),
        cost_estimate=cost,
    )(x_n, w_prepared)

    if B_p != B:
        out_p = out_p[:B]
    if C_p != C:
        out_p = out_p[:, :C]        # slice only the class dim
    return out_p


def fg_classifier(x, weight):
    """Convenience one-shot path. For repeated forwards, call prepare_weight()
    once, cache the result, and reuse fg_classifier_forward()."""
    return fg_classifier_forward(x, prepare_weight(weight), weight.shape[0])


if __name__ == "__main__":
    # Small shapes consistent with the module (feature_dim / num_classes scaled
    # down); intentionally non-aligned to exercise the padding paths.
    B, D, C = 12, 384, 200

    key = jax.random.PRNGKey(0)
    kx, kw = jax.random.split(key)
    x = jax.random.normal(kx, (B, D), dtype=jnp.float32)
    # Deterministic synthetic "init_center" parameter (no checkpoint load).
    weight = jax.random.normal(kw, (C, D), dtype=jnp.float32)

    # One-time weight prep (cached across calls in real use).
    w_prep = jax.block_until_ready(prepare_weight(weight))
    out = jax.block_until_ready(fg_classifier_forward(x, w_prep, C))

    # f32 reference (highest-precision matmul).
    xn = x / jnp.maximum(jnp.linalg.norm(x, axis=1, keepdims=True), _EPS)
    wn = weight / jnp.maximum(jnp.linalg.norm(weight, axis=1, keepdims=True), _EPS)
    ref = jnp.dot(xn, wn.T, precision=jax.lax.Precision.HIGHEST)

    assert out.shape == (B, C)
    # bf16 MXU operands with f32 accumulation: logits in [-1, 1], error << 2e-2.
    assert bool(jnp.allclose(out, ref, atol=2e-2, rtol=2e-2)), "mismatch vs reference"

    print("KERNEL_OK")
</pallas_src>

<mosaic_0001>
module attributes {stable_mosaic.version = 11 : i64} {
  func.func @_fg_kernel(%arg0: i32, %arg1: i32, %arg2: i32, %arg3: memref<12x384xbf16, #tpu.memory_space<vmem>>, %arg4: memref<128x384xbf16, #tpu.memory_space<vmem>>, %arg5: memref<12x128xf32, #tpu.memory_space<vmem>>) attributes {dimension_semantics = [#tpu.dimension_semantics<parallel>, #tpu.dimension_semantics<parallel>, #tpu.dimension_semantics<arbitrary>], iteration_bounds = array<i64: 1, 2, 1>, scalar_prefetch = 0 : i64, scratch_operands = 0 : i64, tpu.core_type = #tpu.core_type<tc>, window_params = [{transform_indices = @transform_0, window_bounds = array<i64: 12, 384>}, {transform_indices = @transform_1, window_bounds = array<i64: 128, 384>}, {transform_indices = @transform_2, window_bounds = array<i64: 12, 128>}]} {
    %c0 = arith.constant 0 : index
    %c0_0 = arith.constant 0 : index
    %0 = vector.load %arg3[%c0, %c0_0] : memref<12x384xbf16, #tpu.memory_space<vmem>>, vector<12x384xbf16>
    %c0_1 = arith.constant 0 : index
    %c0_2 = arith.constant 0 : index
    %1 = vector.load %arg4[%c0_1, %c0_2] : memref<128x384xbf16, #tpu.memory_space<vmem>>, vector<128x384xbf16>
    %cst = arith.constant dense<0.000000e+00> : vector<12x128xf32>
    %2 = tpu.matmul %0, %1, %cst {dimension_numbers = #tpu.dot_dimension_numbers<[1], [1], [0], [0], [0, 0, 1, 0], [], []>} : vector<12x384xbf16>, vector<128x384xbf16>, vector<12x128xf32> -> vector<12x128xf32>
    %c0_i32 = arith.constant 0 : i32
    %3 = arith.cmpi eq, %arg2, %c0_i32 : i32
    %4 = arith.extui %3 : i1 to i32
    %c0_i32_3 = arith.constant 0 : i32
    %5 = arith.cmpi ne, %4, %c0_i32_3 : i32
    scf.if %5 {
      %c0_6 = arith.constant 0 : index
      %c0_7 = arith.constant 0 : index
      %9 = vector.load %arg5[%c0_6, %c0_7] : memref<12x128xf32, #tpu.memory_space<vmem>>, vector<12x128xf32>
      tpu.vector_store %arg5[%c0_6, %c0_7], %2 {strides = array<i32>} : memref<12x128xf32, #tpu.memory_space<vmem>>, vector<12x128xf32>,
    } else {
    }
    %c0_i32_4 = arith.constant 0 : i32
    %6 = arith.cmpi ne, %arg2, %c0_i32_4 : i32
    %7 = arith.extui %6 : i1 to i32
    %c0_i32_5 = arith.constant 0 : i32
    %8 = arith.cmpi ne, %7, %c0_i32_5 : i32
    scf.if %8 {
      %c0_6 = arith.constant 0 : index
      %c0_7 = arith.constant 0 : index
      %9 = vector.load %arg5[%c0_6, %c0_7] : memref<12x128xf32, #tpu.memory_space<vmem>>, vector<12x128xf32>
      %10 = arith.addf %9, %2 : vector<12x128xf32>
      %c0_8 = arith.constant 0 : index
      %c0_9 = arith.constant 0 : index
      %11 = vector.load %arg5[%c0_8, %c0_9] : memref<12x128xf32, #tpu.memory_space<vmem>>, vector<12x128xf32>
      tpu.vector_store %arg5[%c0_8, %c0_9], %10 {strides = array<i32>} : memref<12x128xf32, #tpu.memory_space<vmem>>, vector<12x128xf32>,
    } else {
    }
    return
  }
  func.func @transform_0(%arg0: i32, %arg1: i32, %arg2: i32) -> (i32, i32) {
    %c0_i32 = arith.constant 0 : i32
    return %arg0, %arg2 : i32, i32
  }
  func.func @transform_1(%arg0: i32, %arg1: i32, %arg2: i32) -> (i32, i32) {
    %c0_i32 = arith.constant 0 : i32
    return %arg1, %arg2 : i32, i32
  }
  func.func @transform_2(%arg0: i32, %arg1: i32, %arg2: i32) -> (i32, i32) {
    %c0_i32 = arith.constant 0 : i32
    return %arg0, %arg1 : i32, i32
  }
}

</mosaic_0001>

<bundles_post_ra>
// kernel: tpu_custom_call.1
= control target key start
LH: loop header
LB: loop body
LE: loop exit
PB: predicated region body
PF: predicated region fallthrough
CT: control target
= control target key end

     0   :  { %7 = vsyncpa [#allocation3], 0  ;;  %s1187_s0 = inlined_call_operand.hbm [shape: bf16[12,384], index: 0, kind: input, shape index: {}]   ;;  %s1188_s1 = inlined_call_operand.hbm [shape: bf16[256,384], index: 1, kind: input, shape index: {}]   ;;  %s1189_s2 = inlined_call_operand.hbm [shape: f32[12,256], index: 2, kind: output, shape index: {}]  }
   0x1   :  { %8 = vsyncpa [#allocation6], 0 }
   0x2   :  { %10 = vsyncpa [#allocation6 + $0x1], 0 }
   0x3   :  { %11 = vsyncpa [#allocation4], 0 }
   0x4   :  { %13 = vsyncpa [#allocation4 + $0x1], 0  ;;  %s987_s9 = smov 0   ;;  %s989_s10 = smov 0  }
   0x5   :  { %s991_s11 = smov 0   ;;  %s993_s12 = smov 0  }
   0x6   :  { %s995_s13 = smov 0   ;;  %s997_s14 = smov 0  }
   0x7 LB: > { %s587_s15 = sadd.s32 4294967295, %s964_s14   ;;  %s588_s16 = sadd.s32 4294967294, %s964_s14   ;;  %s964_s14 = sphi %s997_s14, %s19_s14   ;;  %s960_s13 = sphi %s995_s13, %s1200_s13   ;;  %s956_s12 = sphi %s993_s12, %s1199_s12   ;;  %s952_s11 = sphi %s991_s11, %s1198_s11   ;;  %s948_s10 = sphi %s989_s10, %s1197_s10   ;;  %s944_s9 = sphi %s987_s9, %s1196_s9  }
   0x8   : > { %p88_p0 = scmp.ne.s32.totalorder %s948_s10, %s944_s9  ;;  %p1021_p1 = scmp.eq.s32.totalorder %s587_s15, 0 }
   0x9   : > { %p1025_p2 = scmp.eq.s32.totalorder %s587_s15, 1  ;;  %p120_p3 = scmp.eq.s32.totalorder %s588_s16, 1 }
   0xa   : > { %p1031_p4 = por %p1021_p1, %p88_p0  ;;  %p589_p5 = scmp.ge.s32.totalorder %s964_s14, 1 }
   0xb   : > { %p1036_p6 = por %p120_p3, %p88_p0  ;;  %p127_p7 = scmp.lt.s32.totalorder %s964_s14, 3 }
   0xc   : > { %s144_s23 = sshll.u32 %s1187_s0, 4  ;;  %s966_s25 = smov [#allocation2]   ;;  %s145_s23 = int_to_ptr.hbm [resolvable:$true] %s144_s23 }
   0xd   : > { %p1044_p8 = pnand %p589_p5, %p127_p7  ;;  %s146_s26 = sshll.u32 %s966_s25, 4  ;;  %s147_s26 = int_to_ptr.vmem [resolvable:$true] %s146_s26 }
   0xe   : > { %p591_p11 = scmp.ge.s32.totalorder %s964_s14, 2  ;;  %s967_s27 = smov 192  }
   0xf   : > { %p748_p9 = pneg %p1044_p8  ;;  %s968_s28 = smov 12  }
  0x10   : > { %s34_s29 = sadd.s32 1, %s960_s13  ;;  %s75_s30 = sadd.s32 1, %s952_s11 }
  0x11   : > { %p749_p10 = pnand %p748_p9, %p1021_p1  ;;  %p36_p12 = scmp.ge.s32.totalorder %s34_s29, 2 }
  0x12   : > { %p82_p13 = scmp.ne.s32.totalorder %s952_s11, %s948_s10  ;;  %p83_p0 = scmp.eq.s32.totalorder %s964_s14, 0 }
  0x13   : > { %751 = dma.hbm_to_vmem [thread:$0]  (!%p749_p10), %s145_s23, 384, %s147_s26, [#allocation3], %s967_s27, %s967_s27, %s968_s28  }
  0x14   : > { %s1202_s29 = smov (%p36_p12, %s34_s29), 0  ;;  %p84_p3 = por %p83_p0, %p82_p13 }
  0x15   : > { %p1065_p5 = por %p1025_p2, %p82_p13  ;;  %s70_s4 = ssub.s32 %s960_s13, %s1202_s29 }
  0x16   : > { %p761_p7 = scmp.lt.s32.totalorder %s964_s14, 2  ;;  %p73_p9 = scmp.eq.s32.totalorder %s70_s4, 0 }
  0x17   : > { %s160_s5 = sand.u32 1, %s952_s11   ;;  %s738_s8 = smul.u32 192, %s960_s13 }
  0x18   : > { %s737_s6 = smul.u32 192, %s160_s5  ;;  %p753_p10 = pnand %p761_p7, %p84_p3 }
  0x19   : > { %s1074_s7 = scalar_select %p73_p9, %s952_s11, %s75_s30  }
  0x1a   : > { %s164_s15 = scalar_lea.vmem [#allocation5], %s737_s6  ;;  %s172_s23 = scalar_lea.hbm %s1188_s1, %s738_s8 }
  0x1b   : > { %s175_s16 = sshll.u32 %s164_s15, 4  ;;  %s173_s18 = sshll.u32 %s172_s23, 4  ;;  %s176_s16 = int_to_ptr.vmem [resolvable:$true] %s175_s16  ;;  %s174_s18 = int_to_ptr.hbm [resolvable:$true] %s173_s18 }
  0x1c   : > { %s161_s25 = scalar_lea.sflag [#allocation6], %s160_s5  ;;  %187 = sbr.rel (%p1044_p8) target bundleno = 254 (0xfe), region = 28 }
  0x1d   : > { %755 = dma.hbm_to_vmem [thread:$0]  (!%p753_p10), %s174_s18, 3072, %s176_s16, %s161_s25, %s967_s27, %s967_s27, %s968_s28  }
  0x21   : > { %931 = dma.done.wait (%p1021_p1), [#allocation3], 384  }
  0x22   : > { %933 = vsyncadd (%p1021_p1), [#allocation3], 4294966912  ;;  %s1090_s26 = sand.u32 1, %s948_s10  }
  0x23   : > { %s739_s30 = smul.u32 192, %s1090_s26  ;;  %s195_s4 = scalar_lea.sflag [#allocation6], %s1090_s26 }
  0x25   : > { %s1094_s5 = scalar_lea.vmem [#allocation5], %s739_s30 }
  0x26   : > { %935 = dma.done.wait (%p1031_p4), %s195_s4, 3072  }
  0x27   : > { %937 = vsyncadd (%p1031_p4), %s195_s4, 4294964224  ;;  %v696_v0 = vld [vmem:[%s1094_s5 + $0xa8] sm:$0xf]  ;;  %v735_v1 = vld [vmem:[%s1094_s5 + $0xb0] sm:$0xf0]  ;;  %s597_s17 = sshll.u32 %s1090_s26, 4 }
  0x28   : > { %v734_v2 = vld [vmem:[%s1094_s5 + $0xac] sm:$0xf]  ;;  %v697_v3 = vor.u32 %v735_v1, %v696_v0  ;;  %v698_v4 = vld [vmem:[%s1094_s5 + $0xb4] sm:$0xf0]  ;;  %v704_v5 = vld [vmem:[%s1094_s5 + $0xb0] sm:$0xf] }
  0x29   : > { %v736_v6 = vld [vmem:[%s1094_s5 + $0xb8] sm:$0xf0]  ;;  %v701_v7 = vor.u32 %v734_v2, %v698_v4  ;;  %v684_v9 = vld [vmem:[%s1094_s5 + $0x90] sm:$0xf]  ;;  %v731_v11 = vld [vmem:[%s1094_s5 + $0x94] sm:$0xf] }
  0x2a   : > { %v705_v8 = vor.u32 %v736_v6, %v704_v5  ;;  %405 = vmatpush.bf16.xpose.msra.mxu0 %v697_v3  ;;  %v732_v10 = vld [vmem:[%s1094_s5 + $0x98] sm:$0xf0]  ;;  %v686_v12 = vld [vmem:[%s1094_s5 + $0x9c] sm:$0xf0]  ;;  %v692_v13 = vld [vmem:[%s1094_s5 + $0x98] sm:$0xf] }
  0x2b   : > { %419 = vmatpush.bf16.xpose.msra.mxu1 %v701_v7  ;;  %v733_v14 = vld [vmem:[%s1094_s5 + $0xa0] sm:$0xf0]  ;;  %v685_v15 = vor.u32 %v732_v10, %v684_v9  ;;  %v689_v16 = vor.u32 %v731_v11, %v686_v12  ;;  %v672_v18 = vld [vmem:[%s1094_s5 + $0x78] sm:$0xf]  ;;  %v728_v20 = vld [vmem:[%s1094_s5 + $0x7c] sm:$0xf] }
  0x2c   : > { %433 = vmatpush.bf16.xpose.msra.mxu2 %v705_v8  ;;  %v693_v17 = vor.u32 %v733_v14, %v692_v13  ;;  %v729_v19 = vld [vmem:[%s1094_s5 + $0x80] sm:$0xf0]  ;;  %v674_v21 = vld [vmem:[%s1094_s5 + $0x84] sm:$0xf0]  ;;  %v680_v22 = vld [vmem:[%s1094_s5 + $0x80] sm:$0xf] }
  0x2d   : > { %v730_v23 = vld [vmem:[%s1094_s5 + $0x88] sm:$0xf0]  ;;  %v673_v24 = vor.u32 %v729_v19, %v672_v18  ;;  %v677_v25 = vor.u32 %v728_v20, %v674_v21  ;;  %v660_v27 = vld [vmem:[%s1094_s5 + $0x60] sm:$0xf]  ;;  %v725_v29 = vld [vmem:[%s1094_s5 + $0x64] sm:$0xf] }
  0x2e   : > { %v681_v26 = vor.u32 %v730_v23, %v680_v22  ;;  %v726_v28 = vld [vmem:[%s1094_s5 + $0x68] sm:$0xf0]  ;;  %v662_v30 = vld [vmem:[%s1094_s5 + $0x6c] sm:$0xf0]  ;;  %v668_v31 = vld [vmem:[%s1094_s5 + $0x68] sm:$0xf] }
  0x2f   : > { %v727_v32 = vld [vmem:[%s1094_s5 + $0x70] sm:$0xf0]  ;;  %v661_v33 = vor.u32 %v726_v28, %v660_v27  ;;  %v665_v34 = vor.u32 %v725_v29, %v662_v30  ;;  %v648_v36 = vld [vmem:[%s1094_s5 + $0x48] sm:$0xf]  ;;  %v722_v38 = vld [vmem:[%s1094_s5 + $0x4c] sm:$0xf] }
  0x30   : > { %v669_v35 = vor.u32 %v727_v32, %v668_v31  ;;  %v723_v37 = vld [vmem:[%s1094_s5 + $0x50] sm:$0xf0]  ;;  %v650_v39 = vld [vmem:[%s1094_s5 + $0x54] sm:$0xf0]  ;;  %v656_v40 = vld [vmem:[%s1094_s5 + $0x50] sm:$0xf] }
  0x31   : > { %v724_v41 = vld [vmem:[%s1094_s5 + $0x58] sm:$0xf0]  ;;  %v649_v42 = vor.u32 %v723_v37, %v648_v36  ;;  %v653_v43 = vor.u32 %v722_v38, %v650_v39  ;;  %v636_v45 = vld [vmem:[%s1094_s5 + $0x30] sm:$0xf]  ;;  %v719_v47 = vld [vmem:[%s1094_s5 + $0x34] sm:$0xf] }
  0x32   : > { %406 = vmatpush.bf16.xpose.msra.mxu0 %v685_v15  ;;  %v657_v44 = vor.u32 %v724_v41, %v656_v40  ;;  %v720_v46 = vld [vmem:[%s1094_s5 + $0x38] sm:$0xf0]  ;;  %v638_v48 = vld [vmem:[%s1094_s5 + $0x3c] sm:$0xf0]  ;;  %v644_v49 = vld [vmem:[%s1094_s5 + $0x38] sm:$0xf] }
  0x33   : > { %420 = vmatpush.bf16.xpose.msra.mxu1 %v689_v16  ;;  %v721_v50 = vld [vmem:[%s1094_s5 + $0x40] sm:$0xf0]  ;;  %v637_v51 = vor.u32 %v720_v46, %v636_v45  ;;  %v641_v52 = vor.u32 %v719_v47, %v638_v48  ;;  %v624_v54 = vld [vmem:[%s1094_s5 + $0x18] sm:$0xf]  ;;  %v716_v56 = vld [vmem:[%s1094_s5 + $0x1c] sm:$0xf] }
  0x34   : > { %434 = vmatpush.bf16.xpose.msra.mxu2 %v693_v17  ;;  %v645_v53 = vor.u32 %v721_v50, %v644_v49  ;;  %v717_v55 = vld [vmem:[%s1094_s5 + $0x20] sm:$0xf0]  ;;  %v626_v57 = vld [vmem:[%s1094_s5 + $0x24] sm:$0xf0]  ;;  %v632_v58 = vld [vmem:[%s1094_s5 + $0x20] sm:$0xf] }
  0x35   : > { %v718_v59 = vld [vmem:[%s1094_s5 + $0x28] sm:$0xf0]  ;;  %v625_v60 = vor.u32 %v717_v55, %v624_v54  ;;  %v629_v61 = vor.u32 %v716_v56, %v626_v57  ;;  %v612_v63 = vld [vmem:[%s1094_s5] sm:$0xf]  ;;  %v713_v1 = vld [vmem:[%s1094_s5 + $0x4] sm:$0xf] }
  0x36   : > { %v633_v62 = vor.u32 %v718_v59, %v632_v58  ;;  %v714_v0 = vld [vmem:[%s1094_s5 + $0x8] sm:$0xf0]  ;;  %v614_v2 = vld [vmem:[%s1094_s5 + $0xc] sm:$0xf0]  ;;  %v620_v3 = vld [vmem:[%s1094_s5 + $0x8] sm:$0xf] }
  0x37   : > { %v715_v4 = vld [vmem:[%s1094_s5 + $0x10] sm:$0xf0]  ;;  %v613_v5 = vor.u32 %v714_v0, %v612_v63  ;;  %v617_v6 = vor.u32 %v713_v1, %v614_v2  ;;  %v600_v8 = vld [vmem:[#allocation2] sm:$0xf]  ;;  %v710_v10 = vld [vmem:[#allocation2 + $0x4] sm:$0xf] }
  0x38   : > { %v621_v7 = vor.u32 %v715_v4, %v620_v3  ;;  %v711_v9 = vld [vmem:[#allocation2 + $0x8] sm:$0x30]  ;;  %v602_v11 = vld [vmem:[#allocation2 + $0xc] sm:$0x30]  ;;  %v608_v12 = vld [vmem:[#allocation2 + $0x8] sm:$0xf] }
  0x39   : > { %v712_v13 = vld [vmem:[#allocation2 + $0x10] sm:$0x30]  ;;  %v601_v14 = vor.u32 %v711_v9, %v600_v8  ;;  %v605_v15 = vor.u32 %v710_v10, %v602_v11  ;;  %s707_s19 = sshll.u32 %s956_s12, 3  ;;  %s219_s6 = scalar_lea.vmem [#allocation7], %s597_s17 }
  0x3a   : > { %407 = vmatpush.bf16.xpose.msra.mxu0 %v673_v24  ;;  %v609_v16 = vor.u32 %v712_v13, %v608_v12  ;;  %s477_s28 = scalar_lea.hbm %s1189_s2, %s707_s19  ;;  %s478_s8 = sshll.u32 %s219_s6, 4  ;;  %s479_s8 = int_to_ptr.vmem [resolvable:$true] %s478_s8 }
  0x3b   : > { %421 = vmatpush.bf16.xpose.msra.mxu1 %v677_v25  ;;  %s480_s15 = sshll.u32 %s477_s28, 4  ;;  %s464_s12 = scalar_lea.sflag [#allocation4], %s1090_s26  ;;  %s481_s15 = int_to_ptr.hbm [resolvable:$true] %s480_s15 }
  0x3c   : > { %435 = vmatpush.bf16.xpose.msra.mxu2 %v681_v26  ;;  %s892_s16 = sshra.s32 %s481_s15, 4  ;;  %s898_s18 = scalar_lea.hbm %s1189_s2, 32  ;;  %s893_s16 = int_to_ptr.hbm [resolvable:$true] %s892_s16 }
  0x3d   : > { %s894_s21 = scalar_lea.hbm %s893_s16, 16  ;;  %p899_p8 = scmp.lt.s32.totalorder %s893_s16, %s1189_s2 }
  0x3e   : > { %p895_p1 = scmp.ne.s32.totalorder %s893_s16, %s894_s21  ;;  %p900_p12 = scmp.lt.s32.totalorder %s898_s18, %s894_s21 }
  0x40   : > { %p896_p2 = pnand %p895_p1, %p1065_p5  ;;  %p901_p13 = por %p900_p12, %p899_p8 }
  0x42   : > { %408 = vmatpush.bf16.xpose.msra.mxu0 %v661_v33  ;;  %p897_p4 = pneg %p896_p2 }
  0x43   : > { %422 = vmatpush.bf16.xpose.msra.mxu1 %v665_v34 }
  0x44   : > { %436 = vmatpush.bf16.xpose.msra.mxu2 %v669_v35  ;;  %p902_p0 = pnand %p901_p13, %p897_p4 }
  0x4a   : > { %409 = vmatpush.bf16.xpose.msra.mxu0 %v649_v42 }
  0x4b   : > { %423 = vmatpush.bf16.xpose.msra.mxu1 %v653_v43 }
  0x4c   : > { %437 = vmatpush.bf16.xpose.msra.mxu2 %v657_v44 }
  0x52   : > { %410 = vmatpush.bf16.xpose.msra.mxu0 %v637_v51 }
  0x53   : > { %424 = vmatpush.bf16.xpose.msra.mxu1 %v641_v52 }
  0x54   : > { %438 = vmatpush.bf16.xpose.msra.mxu2 %v645_v53 }
  0x5a   : > { %411 = vmatpush.bf16.xpose.msra.mxu0 %v625_v60 }
  0x5b   : > { %425 = vmatpush.bf16.xpose.msra.mxu1 %v629_v61 }
  0x5c   : > { %439 = vmatpush.bf16.xpose.msra.mxu2 %v633_v62 }
  0x62   : > { %412 = vmatpush.bf16.xpose.msra.mxu0 %v613_v5 }
  0x63   : > { %426 = vmatpush.bf16.xpose.msra.mxu1 %v617_v6 }
  0x64   : > { %440 = vmatpush.bf16.xpose.msra.mxu2 %v621_v7 }
  0x69   : > { %413 = vmatmul.bf16.vlgmr.msra.gmra.mxu0 %v601_v14 }
  0x6a   : > { %427 = vmatmul.bf16.vlgmr.msra.gmra.mxu1 %v605_v15 }
  0x6b   : > { %441 = vmatmul.bf16.vlgmr.msra.gmra.mxu2 %v609_v16 }
  0xe6   : > { %v414_v17 = vpop.f32.mrf.mxu0 }
  0xe7   : > { %v428_v18 = vpop.f32.mrf.mxu1 }
  0xe8   : > { %v429_v19 = vadd.f32 %v428_v18, %v414_v17 }
  0xee   : > { %v442_v20 = vpop.f32.mrf.mxu2  ;;  %v416_v22 = vpop.f32.mrf.mxu0 }
  0xef   : > { %v443_v21 = vadd.f32 %v442_v20, %v429_v19  ;;  %v430_v23 = vpop.f32.mrf.mxu1 }
  0xf0   : > { %v431_v24 = vadd.f32 %v430_v23, %v416_v22 }
  0xf1   : > { %451 = vst [vmem:[%s219_s6] sm:$0xff] %v443_v21 }
  0xf6   : > { %v444_v25 = vpop.f32.mrf.mxu2 }
  0xf7   : > { %v445_v26 = vadd.f32 %v444_v25, %v431_v24 }
  0xf9   : > { %452 = vst [vmem:[%s219_s6 + $0x8] sm:$0xf] %v445_v26 }
  0xfa   : > { %905 = shalt.err (!%p902_p0)
}
  0xfb   : > { %s969_s26 = smov 128   ;;  %s970_s4 = smov 256  }
  0xfc   : > { %s971_s5 = smov 8  }
  0xfd   : > { %746 = dma.vmem_to_hbm [thread:$0]  (%p1065_p5), %s479_s8, 256, %s481_s15, %s464_s12, %s969_s26, %s970_s4, %s971_s5  }
  0xfe PF: > { %s495_s17 = sand.u32 1, %s944_s9   ;;  %p757_p3 = pnand %p591_p11, %p1036_p6 }
  0xff   : > { %s496_s19 = scalar_lea.sflag [#allocation4], %s495_s17 }
 0x100   : > { %p758_p7 = pneg %p757_p3 }
 0x102   : > { %939 = dma.done.wait (%p758_p7), %s496_s19, 256  }
 0x103   : > { %941 = vsyncadd (%p758_p7), %s496_s19, 4294967040  ;;  %s19_s14 = sadd.s32 1, %s964_s14   ;;  %s1196_s9 = smov %s948_s10 }
 0x104   : > { %p16_p9 = scmp.ge.s32.totalorder %s19_s14, 4   ;;  %s1197_s10 = smov %s952_s11 }
 0x105   : > { %s1198_s11 = smov %s1074_s7  ;;  %s1199_s12 = smov %s960_s13 }
 0x106   : > { %s1200_s13 = smov %s1202_s29  ;;  %18 = sbr.rel (!%p16_p9) target bundleno = 7 (0x7), region = 87 }
 0x10b   :  { %502 = vsyncpa [#allocation3], 1 }
 0x10c   :  { %504 = vsyncpa [#allocation3 + $0x1], 1 }
 0x10d   :  { %505 = vsyncpa [#allocation6], 1 }
 0x10e   :  { %507 = vsyncpa [#allocation6 + $0x1], 1 }
 0x10f   :  { %508 = vsyncpa [#allocation4], 1 }
 0x110   :  { %510 = vsyncpa [#allocation4 + $0x1], 1 }

</bundles_post_ra>
